<compile_context>
chip_gen: v7x
topology: tpu7x:2x2x1
jax: 0.10.0
libtpu: 0.0.40
codegen_flags: <defaults>
</compile_context>

<pallas_src>
import jax
import jax.numpy as jnp
from jax.experimental import pallas as pl
from jax.experimental.pallas import tpu as pltpu

_LANE = 128


# ---------------------------------------------------------------------------
# Kernels
# ---------------------------------------------------------------------------
def _lstm_cls_kernel(x_ref, ht_ref, ct_ref, w_ref, aux_ref, out_ref):
    """Carried-state LSTM step + classifier.

    x_ref  : (B, in_c)
    ht_ref : (B, hid_c)
    ct_ref : (B, hid_c)
    w_ref  : (in_c + hid_c, 4*hid_c)  stacked [W_x ; W_h], gate order i,f,g,o
    aux_ref: (8, >=4*hid_c)  row0 = fused gate bias, row1 = wcls row, row2[0] = bcls
    out_ref: (B, slab_w)     lanes [0,hid)=ht, [hid,2hid)=ct, [2hid,:)=prob
    """
    B, in_c = x_ref.shape
    hid_c = ht_ref.shape[1]
    g4 = 4 * hid_c

    b = aux_ref[0:1, 0:g4]            # (1, 4*hid) fused input+hidden gate bias
    wcls = aux_ref[1:2, 0:hid_c]      # (1, hid)   classifier weight row
    bcls = aux_ref[2:3, 0:1]          # (1, 1)     classifier bias

    # Two MXU pushes (x half + h half) into one f32 accumulation; no wrapper concat.
    gates = (
        jnp.dot(x_ref[...], w_ref[0:in_c, :], preferred_element_type=jnp.float32)
        + jnp.dot(ht_ref[...], w_ref[in_c:in_c + hid_c, :],
                  preferred_element_type=jnp.float32)
        + b
    )

    # One full-vreg sigmoid pass + one full-vreg tanh pass, then static lane slices.
    sig = jax.nn.sigmoid(gates)
    th = jnp.tanh(gates)
    it = sig[:, 0 * hid_c:1 * hid_c]
    ft = sig[:, 1 * hid_c:2 * hid_c]
    gt = th[:, 2 * hid_c:3 * hid_c]
    ot = sig[:, 3 * hid_c:4 * hid_c]

    ct_new = ft * ct_ref[...] + it * gt
    ht_new = ot * jnp.tanh(ct_new)

    # Classifier: VPU broadcast-mul + lane reduce (avoids an N=1 MXU dot).
    logits = jnp.sum(ht_new * wcls, axis=-1, keepdims=True) + bcls
    prob = jax.nn.sigmoid(logits)                     # (B, 1)

    pad = out_ref.shape[1] - 2 * hid_c
    slab = jnp.concatenate(
        [ht_new, ct_new, jnp.broadcast_to(prob, (B, pad))], axis=-1)
    out_ref[...] = slab.astype(out_ref.dtype)         # single unmasked lane-dense store


def _lstm_cls_kernel_zero_state(x_ref, w_ref, aux_ref, out_ref):
    """Specialized step for state=None (h=c=0): gates = x@W_x + b, c' = i*g.

    x_ref : (B, in_c)
    w_ref : (in_c, 4*hid_c)   input-weight half only
    """
    B = x_ref.shape[0]
    hid_c = w_ref.shape[1] // 4
    g4 = 4 * hid_c

    b = aux_ref[0:1, 0:g4]
    wcls = aux_ref[1:2, 0:hid_c]
    bcls = aux_ref[2:3, 0:1]

    gates = jnp.dot(x_ref[...], w_ref[...],
                    preferred_element_type=jnp.float32) + b

    sig = jax.nn.sigmoid(gates)
    th = jnp.tanh(gates)
    it = sig[:, 0 * hid_c:1 * hid_c]
    # ft * ct == 0 when ct == 0, so the forget gate is skipped.
    gt = th[:, 2 * hid_c:3 * hid_c]
    ot = sig[:, 3 * hid_c:4 * hid_c]

    ct_new = it * gt
    ht_new = ot * jnp.tanh(ct_new)

    logits = jnp.sum(ht_new * wcls, axis=-1, keepdims=True) + bcls
    prob = jax.nn.sigmoid(logits)

    pad = out_ref.shape[1] - 2 * hid_c
    slab = jnp.concatenate(
        [ht_new, ct_new, jnp.broadcast_to(prob, (B, pad))], axis=-1)
    out_ref[...] = slab.astype(out_ref.dtype)


# ---------------------------------------------------------------------------
# Parameter handling
# ---------------------------------------------------------------------------
def init_params(key, in_c, hid_c, dtype=jnp.float32):
    """Per-gate parameters, torch-Linear semantics with weights stored transposed
    (shape (in, out)) so y = x @ W + b."""
    names_shapes = [
        ("wii", (in_c, hid_c)), ("bii", (1, hid_c)),
        ("wif", (in_c, hid_c)), ("bif", (1, hid_c)),
        ("wig", (in_c, hid_c)), ("big", (1, hid_c)),
        ("wio", (in_c, hid_c)), ("bio", (1, hid_c)),
        ("whi", (hid_c, hid_c)), ("bhi", (1, hid_c)),
        ("whf", (hid_c, hid_c)), ("bhf", (1, hid_c)),
        ("whg", (hid_c, hid_c)), ("bhg", (1, hid_c)),
        ("who", (hid_c, hid_c)), ("bho", (1, hid_c)),
        ("wcls", (hid_c, 1)), ("bcls", (1, 1)),
    ]
    params = {}
    keys = jax.random.split(key, len(names_shapes))
    for k, (name, shape) in zip(keys, names_shapes):
        params[name] = 0.1 * jax.random.normal(k, shape, dtype=dtype)
    return params


def pack_params(params):
    """Offline fusion of per-gate weights/biases into kernel-friendly slabs."""
    in_c = params["wii"].shape[0]
    hid_c = params["whi"].shape[0]

    w_x = jnp.concatenate(
        [params["wii"], params["wif"], params["wig"], params["wio"]], axis=1)  # (in_c, 4*hid)
    w_h = jnp.concatenate(
        [params["whi"], params["whf"], params["whg"], params["who"]], axis=1)  # (hid_c, 4*hid)
    w_xh = jnp.concatenate([w_x, w_h], axis=0)                                 # (in_c+hid_c, 4*hid)

    b = jnp.concatenate(
        [params["bii"] + params["bhi"],
         params["bif"] + params["bhf"],
         params["big"] + params["bhg"],
         params["bio"] + params["bho"]], axis=1)                               # (1, 4*hid)

    # One (8, >=128) aux slab holding all tiny params -> one prologue DMA.
    aux_w = max(4 * hid_c, _LANE)
    aux = jnp.zeros((8, aux_w), dtype=b.dtype)
    aux = aux.at[0, 0:4 * hid_c].set(b[0])
    aux = aux.at[1, 0:hid_c].set(params["wcls"][:, 0])
    aux = aux.at[2, 0].set(params["bcls"][0, 0])

    slab_w = max(_LANE, ((2 * hid_c + 1 + _LANE - 1) // _LANE) * _LANE)

    return {
        "w_x": w_x, "w_xh": w_xh, "aux": aux,
        "in_c": in_c, "hid_c": hid_c, "slab_w": slab_w,
    }


# ---------------------------------------------------------------------------
# Wrapper
# ---------------------------------------------------------------------------
def my_lstm_classifier(x, packed, state=None):
    """Forward pass matching MyLstmClassifier.forward.

    x: (B, in_c) or (1, B, in_c) float32
    packed: output of pack_params
    Returns (out (B,1), (ht (B,hid_c), ct (B,hid_c)))
    """
    if x.ndim == 3:
        x = jnp.squeeze(x, axis=0)
    B = x.shape[0]
    hid_c = packed["hid_c"]
    slab_w = packed["slab_w"]

    vmem = lambda: pl.BlockSpec(memory_space=pltpu.MemorySpace.VMEM)

    if state is None:
        # Trace-time specialization: h = c = 0 -> only the x half of the matmul.
        kernel = _lstm_cls_kernel_zero_state
        args = (x, packed["w_x"], packed["aux"])
    else:
        ht, ct = state
        kernel = _lstm_cls_kernel
        args = (x, ht, ct, packed["w_xh"], packed["aux"])

    slab = pl.pallas_call(
        kernel,
        out_shape=jax.ShapeDtypeStruct((B, slab_w), x.dtype),
        in_specs=[vmem() for _ in args],
        out_specs=vmem(),
    )(*args)

    # Single lane-dense output slab; slice once here.
    ht_new = slab[:, 0:hid_c]
    ct_new = slab[:, hid_c:2 * hid_c]
    out = slab[:, 2 * hid_c:2 * hid_c + 1]
    # .detach(): no autograd tape here; plain passthrough.
    return out, (ht_new, ct_new)


# ---------------------------------------------------------------------------
# Pure-JAX reference (unfused, per-gate) for correctness check
# ---------------------------------------------------------------------------
def _reference(x, params, state=None):
    if x.ndim == 3:
        x = jnp.squeeze(x, axis=0)
    B = x.shape[0]
    hid_c = params["whi"].shape[0]
    if state is None:
        ht = jnp.zeros((B, hid_c), x.dtype)
        ct = jnp.zeros((B, hid_c), x.dtype)
    else:
        ht, ct = state

    def lin(a, w, b):
        return a @ w + b

    it = jax.nn.sigmoid(lin(x, params["wii"], params["bii"]) + lin(ht, params["whi"], params["bhi"]))
    ft = jax.nn.sigmoid(lin(x, params["wif"], params["bif"]) + lin(ht, params["whf"], params["bhf"]))
    gt = jnp.tanh(lin(x, params["wig"], params["big"]) + lin(ht, params["whg"], params["bhg"]))
    ot = jax.nn.sigmoid(lin(x, params["wio"], params["bio"]) + lin(ht, params["who"], params["bho"]))
    ct = ft * ct + it * gt
    ht = ot * jnp.tanh(ct)
    out = jax.nn.sigmoid(ht @ params["wcls"] + params["bcls"])
    return out, (ht, ct)


if __name__ == "__main__":
    B, in_c, hid_c = 8, 16, 32
    key = jax.random.PRNGKey(0)
    kx, kp = jax.random.split(key)
    x = jax.random.normal(kx, (B, in_c), dtype=jnp.float32)
    params = init_params(kp, in_c, hid_c)
    packed = pack_params(params)

    # Step 1: zero-state (specialized) path.
    out1, (ht1, ct1) = my_lstm_classifier(x, packed)
    # Step 2: carried-state path (x@W_x + h@W_h, two MXU pushes, no wrapper concat).
    out2, (ht2, ct2) = my_lstm_classifier(x, packed, state=(ht1, ct1))
    jax.block_until_ready((out1, ht1, ct1, out2, ht2, ct2))

    ref_out1, (rht1, rct1) = _reference(x, params)
    ref_out2, (rht2, rct2) = _reference(x, params, state=(rht1, rct1))

    assert out1.shape == (B, 1) and ht1.shape == (B, hid_c) and ct1.shape == (B, hid_c)
    assert out2.shape == (B, 1)
    for got, ref in [(out1, ref_out1), (ht1, rht1), (ct1, rct1),
                     (out2, ref_out2), (ht2, rht2), (ct2, rct2)]:
        assert jnp.allclose(got, ref, atol=1e-5, rtol=1e-5), (
            float(jnp.max(jnp.abs(got - ref))))

    print("KERNEL_OK")
</pallas_src>

<mosaic_0001>
module attributes {stable_mosaic.version = 11 : i64} {
  func.func @_lstm_cls_kernel_zero_state(%arg0: memref<8x16xf32, #tpu.memory_space<vmem>>, %arg1: memref<16x128xf32, #tpu.memory_space<vmem>>, %arg2: memref<8x128xf32, #tpu.memory_space<vmem>>, %arg3: memref<8x128xf32, #tpu.memory_space<vmem>>) attributes {dimension_semantics = [], scalar_prefetch = 0 : i64, scratch_operands = 0 : i64, tpu.core_type = #tpu.core_type<tc>} {
    %c0 = arith.constant 0 : index
    %c0_0 = arith.constant 0 : index
    %0 = vector.load %arg2[%c0, %c0_0] : memref<8x128xf32, #tpu.memory_space<vmem>>, vector<1x128xf32>
    %c1 = arith.constant 1 : index
    %c0_1 = arith.constant 0 : index
    %1 = vector.load %arg2[%c1, %c0_1] : memref<8x128xf32, #tpu.memory_space<vmem>>, vector<1x32xf32>
    %c2 = arith.constant 2 : index
    %c0_2 = arith.constant 0 : index
    %2 = vector.load %arg2[%c2, %c0_2] : memref<8x128xf32, #tpu.memory_space<vmem>>, vector<1x1xf32>
    %c0_3 = arith.constant 0 : index
    %c0_4 = arith.constant 0 : index
    %3 = vector.load %arg0[%c0_3, %c0_4] : memref<8x16xf32, #tpu.memory_space<vmem>>, vector<8x16xf32>
    %c0_5 = arith.constant 0 : index
    %c0_6 = arith.constant 0 : index
    %4 = vector.load %arg1[%c0_5, %c0_6] : memref<16x128xf32, #tpu.memory_space<vmem>>, vector<16x128xf32>
    %cst = arith.constant dense<0.000000e+00> : vector<8x128xf32>
    %5 = tpu.matmul %3, %4, %cst {dimension_numbers = #tpu.dot_dimension_numbers<[1], [0], [0], [1], [0, 0, 1, 1], [], []>} : vector<8x16xf32>, vector<16x128xf32>, vector<8x128xf32> -> vector<8x128xf32>
    %6 = vector.broadcast %0 : vector<1x128xf32> to vector<8x128xf32>
    %7 = arith.addf %5, %6 : vector<8x128xf32>
    %8 = arith.negf %7 : vector<8x128xf32>
    %9 = math.exp %8 : vector<8x128xf32>
    %cst_7 = arith.constant 1.000000e+00 : f32
    %10 = vector.broadcast %cst_7 : f32 to vector<8x128xf32>
    %11 = arith.addf %10, %9 : vector<8x128xf32>
    %12 = arith.divf %10, %11 : vector<8x128xf32>
    %13 = math.tanh %7 : vector<8x128xf32>
    %14 = vector.extract_strided_slice %12 {offsets = [0, 0], sizes = [8, 32], strides = [1, 1]} : vector<8x128xf32> to vector<8x32xf32>
    %15 = vector.extract_strided_slice %13 {offsets = [0, 64], sizes = [8, 32], strides = [1, 1]} : vector<8x128xf32> to vector<8x32xf32>
    %16 = vector.extract_strided_slice %12 {offsets = [0, 96], sizes = [8, 32], strides = [1, 1]} : vector<8x128xf32> to vector<8x32xf32>
    %17 = arith.mulf %14, %15 : vector<8x32xf32>
    %18 = math.tanh %17 : vector<8x32xf32>
    %19 = arith.mulf %16, %18 : vector<8x32xf32>
    %20 = vector.broadcast %1 : vector<1x32xf32> to vector<8x32xf32>
    %21 = arith.mulf %19, %20 : vector<8x32xf32>
    %cst_8 = arith.constant dense<0.000000e+00> : vector<8xf32>
    %22 = vector.multi_reduction <add>, %21, %cst_8 [1] : vector<8x32xf32> to vector<8xf32>
    %23 = vector.shape_cast %22 : vector<8xf32> to vector<8x1xf32>
    %24 = vector.broadcast %2 : vector<1x1xf32> to vector<8x1xf32>
    %25 = arith.addf %23, %24 : vector<8x1xf32>
    %26 = arith.negf %25 : vector<8x1xf32>
    %27 = math.exp %26 : vector<8x1xf32>
    %cst_9 = arith.constant 1.000000e+00 : f32
    %28 = vector.broadcast %cst_9 : f32 to vector<8x1xf32>
    %29 = arith.addf %28, %27 : vector<8x1xf32>
    %30 = arith.divf %28, %29 : vector<8x1xf32>
    %31 = vector.shape_cast %30 : vector<8x1xf32> to vector<8x1xf32>
    %32 = vector.broadcast %31 : vector<8x1xf32> to vector<8x64xf32>
    %33 = tpu.concatenate %19, %17, %32 in 1 : vector<8x32xf32>, vector<8x32xf32>, vector<8x64xf32> -> vector<8x128xf32>
    %c0_10 = arith.constant 0 : index
    %c0_11 = arith.constant 0 : index
    %34 = vector.load %arg3[%c0_10, %c0_11] : memref<8x128xf32, #tpu.memory_space<vmem>>, vector<8x128xf32>
    tpu.vector_store %arg3[%c0_10, %c0_11], %33 {strides = array<i32>} : memref<8x128xf32, #tpu.memory_space<vmem>>, vector<8x128xf32>,
    return
  }
}

</mosaic_0001>

<bundles_post_ra>
// kernel: tpu_custom_call.1
= control target key start
LH: loop header
LB: loop body
LE: loop exit
PB: predicated region body
PF: predicated region fallthrough
CT: control target
= control target key end

     0   :  { %8 = vsyncpa [#allocation3], 0  ;;  %s438_s0 = inlined_call_operand.hbm [shape: f32[8,16], index: 0, kind: input, shape index: {}]   ;;  %s439_s1 = inlined_call_operand.hbm [shape: f32[16,128], index: 1, kind: input, shape index: {}]   ;;  %s440_s2 = inlined_call_operand.hbm [shape: f32[8,128], index: 2, kind: input, shape index: {}]   ;;  %s441_s3 = inlined_call_operand.hbm [shape: f32[8,128], index: 3, kind: output, shape index: {}]  }
   0x1   :  { %9 = vsyncpa [#allocation6], 0 }
   0x2   :  { %10 = vsyncpa [#allocation4], 0  ;;  %s355_s12 = smov [#allocation5]   ;;  %s261_s16 = scalar_lea.hbm %s439_s1, 256 }
   0x3   :  { %s26_s13 = sshll.u32 %s355_s12, 4  ;;  %p262_p0 = scmp.ne.s32.totalorder %s439_s1, %s261_s16  ;;  %s27_s13 = int_to_ptr.vmem [resolvable:$true] %s26_s13 }
   0x4   :  { %p265_p1 = scmp.lt.u32.totalorder %s261_s16, %s439_s1 }
   0x6   :  { %p267_p2 = pnand %p265_p1, %p262_p0 }
   0x8   :  { %270 = shalt.err (!%p267_p2)
}
   0x9   :  { %s271_s21 = scalar_lea.vmem %s27_s13, 256  ;;  %p276_p4 = scmp.lt.s32.totalorder %s27_s13, %s27_s13 }
   0xa   :  { %p272_p3 = scmp.ne.s32.totalorder %s27_s13, %s271_s21  ;;  %p277_p5 = scmp.lt.s32.totalorder %s271_s21, %s271_s21 }
   0xc   :  { %p278_p6 = por %p277_p5, %p276_p4 }
   0xe   :  { %p279_p7 = pnand %p278_p6, %p272_p3 }
  0x10   :  { %282 = shalt.err (!%p279_p7)
}
  0x11   :  { %s356_s22 = smov 128   ;;  %s357_s23 = smov 8  }
  0x12   :  { %32 = dma.hbm_to_vmem [thread:$0]  %s439_s1, 256, %s27_s13, [#allocation6], %s356_s22, %s356_s22, %s357_s23  }
  0x13   :  { %s358_s26 = smov [#allocation2]   ;;  %s359_s28 = smov [#allocation7]  }
  0x14   :  { %s17_s27 = sshll.u32 %s358_s26, 4  ;;  %s39_s29 = sshll.u32 %s359_s28, 4  ;;  %s18_s27 = int_to_ptr.vmem [resolvable:$true] %s17_s27  ;;  %s40_s29 = int_to_ptr.vmem [resolvable:$true] %s39_s29 }
  0x15   :  { %s283_s5 = scalar_lea.hbm %s438_s0, 128 }
  0x16   :  { %p284_p8 = scmp.ne.s32.totalorder %s438_s0, %s283_s5  ;;  %p287_p9 = scmp.lt.u32.totalorder %s283_s5, %s438_s0 }
  0x18   :  { %p289_p10 = pnand %p287_p9, %p284_p8 }
  0x1a   :  { %292 = shalt.err (!%p289_p10)
}
  0x1b   :  { %s293_s1 = scalar_lea.vmem %s18_s27, 128  ;;  %p298_p12 = scmp.lt.s32.totalorder %s18_s27, %s18_s27 }
  0x1c   :  { %p294_p11 = scmp.ne.s32.totalorder %s18_s27, %s293_s1  ;;  %p299_p13 = scmp.lt.s32.totalorder %s293_s1, %s293_s1 }
  0x1e   :  { %p300_p0 = por %p299_p13, %p298_p12 }
  0x20   :  { %p301_p1 = pnand %p300_p0, %p294_p11 }
  0x22   :  { %304 = shalt.err (!%p301_p1)
}
  0x23   :  { %20 = dma.hbm_to_vmem [thread:$0]  %s438_s0, 128, %s18_s27, [#allocation3]  }
  0x24   :  { %s305_s14 = scalar_lea.hbm %s440_s2, 128 }
  0x25   :  { %p306_p2 = scmp.ne.s32.totalorder %s440_s2, %s305_s14  ;;  %p309_p3 = scmp.lt.u32.totalorder %s305_s14, %s440_s2 }
  0x27   :  { %p311_p4 = pnand %p309_p3, %p306_p2 }
  0x29   :  { %314 = shalt.err (!%p311_p4)
}
  0x2a   :  { %s315_s19 = scalar_lea.vmem %s40_s29, 128  ;;  %p320_p6 = scmp.lt.s32.totalorder %s40_s29, %s40_s29 }
  0x2b   :  { %p316_p5 = scmp.ne.s32.totalorder %s40_s29, %s315_s19  ;;  %p321_p7 = scmp.lt.s32.totalorder %s315_s19, %s315_s19 }
  0x2d   :  { %p322_p8 = por %p321_p7, %p320_p6 }
  0x2f   :  { %p323_p9 = pnand %p322_p8, %p316_p5 }
  0x31   :  { %326 = shalt.err (!%p323_p9)
}
  0x32   :  { %42 = dma.hbm_to_vmem [thread:$0]  %s440_s2, 128, %s40_s29, [#allocation6]  }
  0x33   :  { %349 = dma.done.wait [#allocation3], 128  }
  0x34   :  { %350 = vsyncadd [#allocation3], 4294967168 }
  0x35   :  { %351 = dma.done.wait [#allocation6], 384  }
  0x36   :  { %352 = vsyncadd [#allocation6], 4294966912  ;;  %v360_v0 = vmov 0.0|0.0   ;;  %vm361_vm0 = vmmov 0   ;;  %v362_v1 = vmov 0.0   ;;  %v56_v2 = vld [vmem:[#allocation5] sm:$0xff] }
  0x37   :  { %231 = vmatprep.subr.bf16.mxu0 %v360_v0  ;;  %228 = vmatprep.mubr.msk.f32.mxu0 %vm361_vm0, %v362_v1  ;;  %v57_v3 = vld [vmem:[#allocation5 + $0x8] sm:$0xff]  ;;  %v55_v5 = vld [vmem:[#allocation2] sm:$0xff]  ;;  %vm62_vm1 = vcmask 130048   ;;  %v215_v6 = vld [vmem:[#allocation7] ss:$0 sm:$0xff]  ;;  %s363_s2 = smov 64  }
  0x38   :  { %v232_v4 = vpack.c.bf16 %v57_v3, %v56_v2  ;;  %v218_v11 = vld [vmem:[#allocation7 + $0x1] ss:$0 sm:$0xff]  ;;  %s364_s21 = smov 96   ;;  %s365_s22 = smov 32   ;;  %vm167_vm2 = vcmask 261120   ;;  %v366_v25 = vmov 0  }
  0x39   :  { %159 = vrot.lane.b32.xlu1 %v218_v11, %s364_s21  ;;  %248 = vset.pattern.permute.xlu0 %v366_v25  ;;  %v219_v26 = vld [vmem:[#allocation7 + $0x2] ss:$0 sm:$0xff]  ;;  %s367_s23 = smov [#allocation8]   ;;  %vm196_vm3 = vcmask 523264  }
  0x3a   :  { %233 = vmatpush3.bf16.msra.mxu0 %v232_v4  ;;  %247 = vset.pattern.permute.xlu1 %v366_v25  ;;  %s205_s24 = sshll.u32 %s367_s23, 4  ;;  %s206_s24 = int_to_ptr.vmem [resolvable:$true] %s205_s24 }
  0x3b   :  { %s327_s25 = scalar_lea.vmem %s206_s24, 128  ;;  %p332_p11 = scmp.lt.s32.totalorder %s206_s24, %s206_s24 }
  0x3c   :  { %p328_p10 = scmp.ne.s32.totalorder %s206_s24, %s327_s25  ;;  %p333_p12 = scmp.lt.s32.totalorder %s327_s25, %s327_s25 }
  0x3d   :  { %229 = vmatmul.mubr.msk.f32.vlgmr.msra.gmra.mrb[0].mxu0 %vm62_vm1, %v55_v5 }
  0x3e   :  { %p334_p13 = por %p333_p12, %p332_p11 }
  0x40   :  { %p335_p0 = pnand %p334_p13, %p328_p10 }
  0xab   :  { %v160_v20 = vpop.permute.xlu1 %159 }
 0x110   :  { %v132_v7 = vpop.f32.mrb[0].mxu0 }
 0x111   :  { %v133_v8 = vadd.f32 %v215_v6, %v132_v7  ;;  %v230_v9 = vpop.f32.mrb[1].mxu0 }
 0x113   :  { %249 = vtanh.f32 %v133_v8  ;;  %v217_v12 = vmul.f32 -1.442695, %v133_v8 }
 0x115   :  { %251 = vpow2.f32 %v217_v12 }
 0x11d   :  { %v250_v10 = vpop.eup %249 }
 0x11e   :  { %144 = vrot.lane.b32.xlu0 %v250_v10, %s363_s2 }
 0x11f   :  { %v252_v13 = vpop.eup %251 }
 0x120   :  { %v139_v14 = vadd.f32 1.0, %v252_v13 }
 0x122   :  { %253 = vrcp.f32 %v139_v14 }
 0x12c   :  { %v254_v15 = vpop.eup %253 }
 0x190   :  { %v145_v16 = vpop.permute.xlu0 %144 }
 0x191   :  { %v147_v17 = vmul.f32 %v254_v15, %v145_v16 }
 0x193   :  { %255 = vtanh.f32 %v147_v17 }
 0x19d   :  { %v256_v18 = vpop.eup %255 }
 0x19e   :  { %150 = vrot.lane.b32.xlu0 %v256_v18, %s364_s21 }
 0x210   :  { %v151_v19 = vpop.permute.xlu0 %150 }
 0x211   :  { %v153_v21 = vmul.f32 %v254_v15, %v151_v19 }
 0x213   :  { %v162_v22 = vmul.f32 %v160_v20, %v153_v21 }
 0x215   :  { %164 = vrot.lane.b32.xlu1 %v162_v22, %s365_s22 }
 0x287   :  { %v165_v23 = vpop.permute.xlu1 %164 }
 0x288   :  { %v168_v24 = vsel %vm167_vm2, %v165_v23, 0.0 }
 0x289   :  { %169 = vadd.xlane.f32.xlu0 %v168_v24 }
 0x316   :  { %v170_v27 = vpop.xlane.xlu0 %169 }
 0x317   :  { %v175_v28 = vadd.f32 %v219_v26, %v170_v27 }
 0x319   :  { %v220_v29 = vmul.f32 -1.442695, %v175_v28 }
 0x31b   :  { %257 = vpow2.f32 %v220_v29 }
 0x325   :  { %v258_v30 = vpop.eup %257 }
 0x326   :  { %v179_v31 = vadd.f32 1.0, %v258_v30 }
 0x328   :  { %259 = vrcp.f32 %v179_v31 }
 0x332   :  { %v260_v32 = vpop.eup %259 }
 0x333   :  { %184 = vperm.xlu1 %247, %v260_v32  }
 0x337   :  { %188 = vrot.lane.b32.xlu1 %v153_v21, %s365_s22 }
 0x33b   :  { %192 = vrot.lane.b32.xlu1 %v147_v17, %s365_s22 }
 0x3b2   :  { %v185_v33 = vpop.permute.xlu1 %184 }
 0x3b6   :  { %v189_v34 = vpop.permute.xlu1 %188 }
 0x3ba   :  { %v193_v35 = vpop.permute.xlu1 %192 }
 0x3bb   :  { %v195_v36 = vsel %vm167_vm2, %v189_v34, %v193_v35 }
 0x3bc   :  { %v197_v37 = vsel %vm196_vm3, %v195_v36, %v185_v33 }
 0x3bd   :  { %198 = vst [vmem:[#allocation8] sm:$0xff] %v197_v37 }
 0x3be   :  { %338 = shalt.err (!%p335_p0)
}
 0x3bf   :  { %s339_s28 = scalar_lea.hbm %s441_s3, 128 }
 0x3c0   :  { %p340_p1 = scmp.ne.s32.totalorder %s441_s3, %s339_s28  ;;  %p343_p2 = scmp.lt.u32.totalorder %s339_s28, %s441_s3 }
 0x3c2   :  { %p345_p3 = pnand %p343_p2, %p340_p1 }
 0x3c4   :  { %348 = shalt.err (!%p345_p3)
}
 0x3c5   :  { %208 = dma.vmem_to_hbm [thread:$0]  %s206_s24, 128, %s441_s3, [#allocation4]  }
 0x3c6   :  { %353 = dma.done.wait [#allocation4], 128  }
 0x3c7   :  { %354 = vsyncadd [#allocation4], 4294967168 }
 0x3c8   :  { %212 = vsyncpa [#allocation3], 1 }
 0x3c9   :  { %213 = vsyncpa [#allocation6], 1 }
 0x3ca   :  { %214 = vsyncpa [#allocation4], 1 }

</bundles_post_ra>
